<compile_context>
chip_gen: v7x
topology: tpu7x:2x2x1
jax: 0.10.0
libtpu: 0.0.40
codegen_flags: <defaults>
</compile_context>

<pallas_src>
import jax
import jax.numpy as jnp
from jax.experimental import pallas as pl
from jax.experimental.pallas import tpu as pltpu

ACT_DIM = 3
OBS_DIM = 1 + 1 + 3 + 8 * 8   # 69
HIDDEN = 256

HEAD_PAD = 128    # fused head width: mu in lanes [0, ACT_DIM), log_std at LS_OFF
LS_OFF = 64       # lane offset of the log_std block inside the fused head
B_TILE = 512      # max batch rows per grid step
MIN_SPLIT = 256   # batches with >= this many (padded) rows get >= 2 tiles (v7x)


def actor_kernel(x_ref, w1_ref, b1_ref, w2_ref, b2_ref, wh_ref, bh_ref, out_ref):
    dt = w1_ref.dtype                      # f32 or bf16 (weights); accum always f32
    x = x_ref[...].astype(dt)
    h1 = jnp.maximum(
        jnp.dot(x, w1_ref[...], preferred_element_type=jnp.float32)
        + b1_ref[...], 0.0)
    h2 = jnp.maximum(
        jnp.dot(h1.astype(dt), w2_ref[...], preferred_element_type=jnp.float32)
        + b2_ref[...], 0.0)
    # Fused head: mu in lanes [0, ACT_DIM), log_std in lanes [LS_OFF, LS_OFF+ACT_DIM).
    # The log_std[:,1] = log_std[:,2] = -10 override is baked into wh/bh.
    head = (jnp.dot(h2.astype(dt), wh_ref[...], preferred_element_type=jnp.float32)
            + bh_ref[...])
    # Single lane-dense 128-wide store: mu lanes keep head, std lanes get
    # max(exp(head), 1e-6).  exp input is masked so mu lanes cannot overflow.
    lane = jax.lax.broadcasted_iota(jnp.int32, head.shape, 1)
    is_std = lane >= LS_OFF
    std_val = jnp.maximum(jnp.exp(jnp.where(is_std, head, 0.0)), jnp.float32(1e-6))
    out_ref[...] = jnp.where(is_std, std_val, head)


def prepare_params(params, compute_dtype=jnp.float32):
    """Pack the raw parameters once (outside the hot path).

    compute_dtype=jnp.bfloat16 stores weights in bf16 (half the weight DMA,
    bf16-native MXU); matmuls still accumulate in f32 and biases stay f32.
    """
    w1, b1, w2, b2, wmu, bmu, wls, bls = params

    w1_p = w1.astype(compute_dtype)                     # (OBS_DIM, HIDDEN)
    b1_p = b1.reshape(1, HIDDEN).astype(jnp.float32)
    w2_p = w2.astype(compute_dtype)                     # (HIDDEN, HIDDEN)
    b2_p = b2.reshape(1, HIDDEN).astype(jnp.float32)

    # Fused head weight/bias with the constant log_std override baked in: only
    # column 0 of log_std is data-dependent; columns 1, 2 become bias = -10.
    wh = jnp.zeros((HIDDEN, HEAD_PAD), jnp.float32)
    wh = wh.at[:, :ACT_DIM].set(wmu)
    wh = wh.at[:, LS_OFF:LS_OFF + 1].set(wls[:, 0:1])
    bh = jnp.zeros((1, HEAD_PAD), jnp.float32)
    bh = bh.at[0, :ACT_DIM].set(bmu)
    bh = bh.at[0, LS_OFF].set(bls[0])
    bh = bh.at[0, LS_OFF + 1].set(-10.0)
    bh = bh.at[0, LS_OFF + 2].set(-10.0)

    return (w1_p, b1_p, w2_p, b2_p, wh.astype(compute_dtype), bh)


@jax.jit
def actor_forward(x, packed):
    """x: (B, OBS_DIM) f32. packed: output of prepare_params.
    Returns (mu, std), each (B, ACT_DIM) f32."""
    w1_p, b1_p, w2_p, b2_p, wh, bh = packed
    B = x.shape[0]

    # Batch tiling: round rows to the sublane (8); split big batches into >= 2
    # roughly-equal tiles so both v7x TensorCores get work; cap at B_TILE.
    b_rows = max(8, pl.cdiv(B, 8) * 8)
    if b_rows >= MIN_SPLIT:
        tb = min(B_TILE, pl.cdiv(pl.cdiv(b_rows, 2), 8) * 8)
    else:
        tb = b_rows
    b_pad = pl.cdiv(b_rows, tb) * tb
    n_tiles = b_pad // tb

    x = x.astype(jnp.float32)
    if b_pad != B:
        x = jnp.pad(x, ((0, b_pad - B), (0, 0)))   # pad batch rows only, no lane pad

    vmem = pltpu.MemorySpace.VMEM
    w_spec = lambda shape: pl.BlockSpec(shape, lambda i: (0, 0), memory_space=vmem)
    row_spec = lambda shape: pl.BlockSpec(shape, lambda i: (i, 0), memory_space=vmem)

    out = pl.pallas_call(
        actor_kernel,
        out_shape=jax.ShapeDtypeStruct((b_pad, HEAD_PAD), jnp.float32),
        grid=(n_tiles,),
        in_specs=[
            row_spec((tb, OBS_DIM)),                     # x tile (batch-parallel)
            w_spec((OBS_DIM, HIDDEN)), w_spec((1, HIDDEN)),
            w_spec((HIDDEN, HIDDEN)), w_spec((1, HIDDEN)),
            w_spec((HIDDEN, HEAD_PAD)), w_spec((1, HEAD_PAD)),
        ],
        out_specs=row_spec((tb, HEAD_PAD)),
        compiler_params=pltpu.CompilerParams(
            dimension_semantics=("parallel",)),
    )(x, w1_p, b1_p, w2_p, b2_p, wh, bh)

    mu = out[:B, :ACT_DIM]
    std = out[:B, LS_OFF:LS_OFF + ACT_DIM]
    return mu, std


def xavier_uniform(key, fan_in, fan_out):
    # Matches torch.nn.init.xavier_uniform_ (gain=1): U(-a, a), a = sqrt(6/(fan_in+fan_out)).
    # Stored as (fan_in, fan_out) == transpose of PyTorch's (out, in) weight.
    a = jnp.sqrt(6.0 / (fan_in + fan_out))
    return jax.random.uniform(key, (fan_in, fan_out), jnp.float32, -a, a)


def make_params(key):
    k1, k2, k3, k4 = jax.random.split(key, 4)
    w1 = xavier_uniform(k1, OBS_DIM, HIDDEN)
    w2 = xavier_uniform(k2, HIDDEN, HIDDEN)
    wmu = xavier_uniform(k3, HIDDEN, ACT_DIM)
    wls = xavier_uniform(k4, HIDDEN, ACT_DIM)
    b1 = jnp.zeros((HIDDEN,), jnp.float32)
    b2 = jnp.zeros((HIDDEN,), jnp.float32)
    bmu = jnp.zeros((ACT_DIM,), jnp.float32)
    bls = jnp.zeros((ACT_DIM,), jnp.float32)
    return (w1, b1, w2, b2, wmu, bmu, wls, bls)


def actor_forward_ref(x, params):
    """Plain-JAX reference matching the PyTorch forward."""
    w1, b1, w2, b2, wmu, bmu, wls, bls = params
    h1 = jnp.maximum(x @ w1 + b1, 0.0)
    h2 = jnp.maximum(h1 @ w2 + b2, 0.0)
    mu = h2 @ wmu + bmu
    log_std = h2 @ wls + bls
    log_std = log_std.at[:, 1].set(-10.0).at[:, 2].set(-10.0)
    std = jnp.maximum(jnp.exp(log_std), 1e-6)
    return mu, std


if __name__ == "__main__":
    key = jax.random.PRNGKey(0)
    pkey, xkey = jax.random.split(key)
    params = make_params(pkey)

    batch = 2
    x = jax.random.normal(xkey, (batch, OBS_DIM), jnp.float32)
    mu_ref, std_ref = actor_forward_ref(x, params)

    # f32 weight path: matches the reference to 1e-5.
    packed_f32 = prepare_params(params, jnp.float32)
    mu, std = actor_forward(x, packed_f32)
    jax.block_until_ready((mu, std))
    assert mu.shape == (batch, ACT_DIM) and std.shape == (batch, ACT_DIM)
    assert jnp.allclose(mu, mu_ref, atol=1e-5, rtol=1e-5)
    assert jnp.allclose(std, std_ref, atol=1e-5, rtol=1e-5)

    # bf16 weight path: 2x less weight DMA + bf16-native MXU, looser tolerance.
    packed_bf16 = prepare_params(params, jnp.bfloat16)
    mu_b, std_b = actor_forward(x, packed_bf16)
    jax.block_until_ready((mu_b, std_b))
    assert mu_b.shape == (batch, ACT_DIM) and std_b.shape == (batch, ACT_DIM)
    assert jnp.allclose(mu_b, mu_ref, atol=5e-2, rtol=5e-2)
    assert jnp.allclose(std_b, std_ref, atol=5e-2, rtol=5e-2)

    print("KERNEL_OK")
</pallas_src>

<mosaic_0001>
module attributes {stable_mosaic.version = 11 : i64} {
  func.func @actor_kernel(%arg0: i32, %arg1: memref<8x69xf32, #tpu.memory_space<vmem>>, %arg2: memref<69x256xf32, #tpu.memory_space<vmem>>, %arg3: memref<1x256xf32, #tpu.memory_space<vmem>>, %arg4: memref<256x256xf32, #tpu.memory_space<vmem>>, %arg5: memref<1x256xf32, #tpu.memory_space<vmem>>, %arg6: memref<256x128xf32, #tpu.memory_space<vmem>>, %arg7: memref<1x128xf32, #tpu.memory_space<vmem>>, %arg8: memref<8x128xf32, #tpu.memory_space<vmem>>) attributes {dimension_semantics = [#tpu.dimension_semantics<parallel>], iteration_bounds = array<i64: 1>, scalar_prefetch = 0 : i64, scratch_operands = 0 : i64, tpu.core_type = #tpu.core_type<tc>, window_params = [{transform_indices = @transform_0, window_bounds = array<i64: 8, 69>}, {pipeline_mode = #tpu.pipeline_mode<synchronous>, transform_indices = @transform_1, window_bounds = array<i64: 69, 256>}, {pipeline_mode = #tpu.pipeline_mode<synchronous>, transform_indices = @transform_2, window_bounds = array<i64: 1, 256>}, {pipeline_mode = #tpu.pipeline_mode<synchronous>, transform_indices = @transform_3, window_bounds = array<i64: 256, 256>}, {pipeline_mode = #tpu.pipeline_mode<synchronous>, transform_indices = @transform_4, window_bounds = array<i64: 1, 256>}, {pipeline_mode = #tpu.pipeline_mode<synchronous>, transform_indices = @transform_5, window_bounds = array<i64: 256, 128>}, {pipeline_mode = #tpu.pipeline_mode<synchronous>, transform_indices = @transform_6, window_bounds = array<i64: 1, 128>}, {transform_indices = @transform_7, window_bounds = array<i64: 8, 128>}]} {
    %c0 = arith.constant 0 : index
    %c0_0 = arith.constant 0 : index
    %0 = vector.load %arg1[%c0, %c0_0] : memref<8x69xf32, #tpu.memory_space<vmem>>, vector<8x69xf32>
    %c0_1 = arith.constant 0 : index
    %c0_2 = arith.constant 0 : index
    %1 = vector.load %arg2[%c0_1, %c0_2] : memref<69x256xf32, #tpu.memory_space<vmem>>, vector<69x256xf32>
    %cst = arith.constant dense<0.000000e+00> : vector<8x256xf32>
    %2 = tpu.matmul %0, %1, %cst {dimension_numbers = #tpu.dot_dimension_numbers<[1], [0], [0], [1], [0, 0, 1, 1], [], []>} : vector<8x69xf32>, vector<69x256xf32>, vector<8x256xf32> -> vector<8x256xf32>
    %c0_3 = arith.constant 0 : index
    %c0_4 = arith.constant 0 : index
    %3 = vector.load %arg3[%c0_3, %c0_4] : memref<1x256xf32, #tpu.memory_space<vmem>>, vector<1x256xf32>
    %4 = vector.broadcast %3 : vector<1x256xf32> to vector<8x256xf32>
    %5 = arith.addf %2, %4 : vector<8x256xf32>
    %cst_5 = arith.constant 0.000000e+00 : f32
    %6 = vector.broadcast %cst_5 : f32 to vector<8x256xf32>
    %7 = arith.maximumf %5, %6 : vector<8x256xf32>
    %c0_6 = arith.constant 0 : index
    %c0_7 = arith.constant 0 : index
    %8 = vector.load %arg4[%c0_6, %c0_7] : memref<256x256xf32, #tpu.memory_space<vmem>>, vector<256x256xf32>
    %cst_8 = arith.constant dense<0.000000e+00> : vector<8x256xf32>
    %9 = tpu.matmul %7, %8, %cst_8 {dimension_numbers = #tpu.dot_dimension_numbers<[1], [0], [0], [1], [0, 0, 1, 1], [], []>} : vector<8x256xf32>, vector<256x256xf32>, vector<8x256xf32> -> vector<8x256xf32>
    %c0_9 = arith.constant 0 : index
    %c0_10 = arith.constant 0 : index
    %10 = vector.load %arg5[%c0_9, %c0_10] : memref<1x256xf32, #tpu.memory_space<vmem>>, vector<1x256xf32>
    %11 = vector.broadcast %10 : vector<1x256xf32> to vector<8x256xf32>
    %12 = arith.addf %9, %11 : vector<8x256xf32>
    %cst_11 = arith.constant 0.000000e+00 : f32
    %13 = vector.broadcast %cst_11 : f32 to vector<8x256xf32>
    %14 = arith.maximumf %12, %13 : vector<8x256xf32>
    %c0_12 = arith.constant 0 : index
    %c0_13 = arith.constant 0 : index
    %15 = vector.load %arg6[%c0_12, %c0_13] : memref<256x128xf32, #tpu.memory_space<vmem>>, vector<256x128xf32>
    %cst_14 = arith.constant dense<0.000000e+00> : vector<8x128xf32>
    %16 = tpu.matmul %14, %15, %cst_14 {dimension_numbers = #tpu.dot_dimension_numbers<[1], [0], [0], [1], [0, 0, 1, 1], [], []>} : vector<8x256xf32>, vector<256x128xf32>, vector<8x128xf32> -> vector<8x128xf32>
    %c0_15 = arith.constant 0 : index
    %c0_16 = arith.constant 0 : index
    %17 = vector.load %arg7[%c0_15, %c0_16] : memref<1x128xf32, #tpu.memory_space<vmem>>, vector<1x128xf32>
    %18 = vector.broadcast %17 : vector<1x128xf32> to vector<8x128xf32>
    %19 = arith.addf %16, %18 : vector<8x128xf32>
    %20 = tpu.iota {dimensions = array<i32: 1>} : vector<8x128xi32>
    %c64_i32 = arith.constant 64 : i32
    %21 = vector.broadcast %c64_i32 : i32 to vector<8x128xi32>
    %22 = arith.cmpi sge, %20, %21 : vector<8x128xi32>
    %cst_17 = arith.constant 0.000000e+00 : f32
    %23 = vector.broadcast %cst_17 : f32 to vector<8x128xf32>
    %24 = arith.select %22, %19, %23 : vector<8x128xi1>, vector<8x128xf32>
    %25 = math.exp %24 : vector<8x128xf32>
    %cst_18 = arith.constant 9.99999997E-7 : f32
    %26 = vector.broadcast %cst_18 : f32 to vector<8x128xf32>
    %27 = arith.maximumf %25, %26 : vector<8x128xf32>
    %28 = arith.select %22, %27, %19 : vector<8x128xi1>, vector<8x128xf32>
    %c0_19 = arith.constant 0 : index
    %c0_20 = arith.constant 0 : index
    %29 = vector.load %arg8[%c0_19, %c0_20] : memref<8x128xf32, #tpu.memory_space<vmem>>, vector<8x128xf32>
    tpu.vector_store %arg8[%c0_19, %c0_20], %28 {strides = array<i32>} : memref<8x128xf32, #tpu.memory_space<vmem>>, vector<8x128xf32>,
    return
  }
  func.func @transform_0(%arg0: i32) -> (i32, i32) {
    %c0_i32 = arith.constant 0 : i32
    %c0_i32_0 = arith.constant 0 : i32
    return %arg0, %c0_i32 : i32, i32
  }
  func.func @transform_1(%arg0: i32) -> (i32, i32) {
    %c0_i32 = arith.constant 0 : i32
    %c0_i32_0 = arith.constant 0 : i32
    %c0_i32_1 = arith.constant 0 : i32
    return %c0_i32, %c0_i32_0 : i32, i32
  }
  func.func @transform_2(%arg0: i32) -> (i32, i32) {
    %c0_i32 = arith.constant 0 : i32
    %c0_i32_0 = arith.constant 0 : i32
    %c0_i32_1 = arith.constant 0 : i32
    return %c0_i32, %c0_i32_0 : i32, i32
  }
  func.func @transform_3(%arg0: i32) -> (i32, i32) {
    %c0_i32 = arith.constant 0 : i32
    %c0_i32_0 = arith.constant 0 : i32
    %c0_i32_1 = arith.constant 0 : i32
    return %c0_i32, %c0_i32_0 : i32, i32
  }
  func.func @transform_4(%arg0: i32) -> (i32, i32) {
    %c0_i32 = arith.constant 0 : i32
    %c0_i32_0 = arith.constant 0 : i32
    %c0_i32_1 = arith.constant 0 : i32
    return %c0_i32, %c0_i32_0 : i32, i32
  }
  func.func @transform_5(%arg0: i32) -> (i32, i32) {
    %c0_i32 = arith.constant 0 : i32
    %c0_i32_0 = arith.constant 0 : i32
    %c0_i32_1 = arith.constant 0 : i32
    return %c0_i32, %c0_i32_0 : i32, i32
  }
  func.func @transform_6(%arg0: i32) -> (i32, i32) {
    %c0_i32 = arith.constant 0 : i32
    %c0_i32_0 = arith.constant 0 : i32
    %c0_i32_1 = arith.constant 0 : i32
    return %c0_i32, %c0_i32_0 : i32, i32
  }
  func.func @transform_7(%arg0: i32) -> (i32, i32) {
    %c0_i32 = arith.constant 0 : i32
    %c0_i32_0 = arith.constant 0 : i32
    return %arg0, %c0_i32 : i32, i32
  }
}

</mosaic_0001>

<bundles_post_ra>
// kernel: actor_forward.1
= control target key start
LH: loop header
LB: loop body
LE: loop exit
PB: predicated region body
PF: predicated region fallthrough
CT: control target
= control target key end

     0   :  { %12 = vsyncpa [#allocation3], 0  ;;  %s794_s0 = inlined_call_operand.vmem [shape: f32[8,69], index: 0, kind: input, shape index: {}]   ;;  %s795_s1 = inlined_call_operand.hbm [shape: f32[69,256], index: 1, kind: input, shape index: {}]   ;;  %s796_s2 = inlined_call_operand.vmem [shape: f32[1,256], index: 2, kind: input, shape index: {}]   ;;  %s797_s3 = inlined_call_operand.hbm [shape: f32[256,256], index: 3, kind: input, shape index: {}]   ;;  %s798_s4 = inlined_call_operand.vmem [shape: f32[1,256], index: 4, kind: input, shape index: {}]   ;;  %s799_s5 = inlined_call_operand.hbm [shape: f32[256,128], index: 5, kind: input, shape index: {}]   ;;  %s800_s6 = inlined_call_operand.vmem [shape: f32[1,128], index: 6, kind: input, shape index: {}]   ;;  %s801_s7 = inlined_call_operand.vmem [shape: f32[8,128], index: 7, kind: output, shape index: {}]  }
   0x1   :  { %13 = vsyncpa [#allocation5], 0  ;;  %s686_s24 = smov [#allocation4]   ;;  %s687_s26 = smov [#allocation2]  }
   0x2   :  { %s35_s25 = sshll.u32 %s686_s24, 4  ;;  %s21_s27 = sshll.u32 %s687_s26, 4  ;;  %s36_s25 = int_to_ptr.vmem [resolvable:$true] %s35_s25  ;;  %s734_s27 = int_to_ptr.vmem [resolvable:$true] %s21_s27 }
   0x3   :  { %s616_s30 = scalar_lea.hbm %s797_s3, 8192 }
   0x4   :  { %p617_p0 = scmp.ne.s32.totalorder %s797_s3, %s616_s30  ;;  %p620_p1 = scmp.lt.u32.totalorder %s616_s30, %s797_s3 }
   0x6   :  { %p622_p2 = pnand %p620_p1, %p617_p0 }
   0x8   :  { %625 = shalt.err (!%p622_p2)
}
   0x9   :  { %s626_s12 = scalar_lea.vmem %s36_s25, 8192  ;;  %p631_p4 = scmp.lt.s32.totalorder %s36_s25, %s36_s25 }
   0xa   :  { %p627_p3 = scmp.ne.s32.totalorder %s36_s25, %s626_s12  ;;  %p632_p5 = scmp.lt.s32.totalorder %s626_s12, %s626_s12 }
   0xc   :  { %p633_p6 = por %p632_p5, %p631_p4 }
   0xe   :  { %p634_p7 = pnand %p633_p6, %p627_p3 }
  0x10   :  { %637 = shalt.err (!%p634_p7)
}
  0x11   :  { %s688_s13 = smov 256   ;;  %s689_s14 = smov 16  }
  0x12   :  { %41 = dma.hbm_to_vmem [thread:$0]  %s797_s3, 8192, %s36_s25, [#allocation5], %s688_s13, %s688_s13, %s689_s14  }
  0x13   :  { %s638_s19 = scalar_lea.hbm %s795_s1, 2304 }
  0x14   :  { %p639_p8 = scmp.ne.s32.totalorder %s795_s1, %s638_s19  ;;  %p642_p9 = scmp.lt.u32.totalorder %s638_s19, %s795_s1 }
  0x16   :  { %p644_p10 = pnand %p642_p9, %p639_p8 }
  0x18   :  { %647 = shalt.err (!%p644_p10)
}
  0x19   :  { %s648_s24 = scalar_lea.vmem %s734_s27, 2304  ;;  %p653_p12 = scmp.lt.s32.totalorder %s734_s27, %s734_s27 }
  0x1a   :  { %p649_p11 = scmp.ne.s32.totalorder %s734_s27, %s648_s24  ;;  %p654_p13 = scmp.lt.s32.totalorder %s648_s24, %s648_s24 }
  0x1c   :  { %p655_p0 = por %p654_p13, %p653_p12 }
  0x1e   :  { %p656_p1 = pnand %p655_p0, %p649_p11 }
  0x20   :  { %659 = shalt.err (!%p656_p1)
}
  0x21   :  { %27 = dma.hbm_to_vmem [thread:$0]  %s795_s1, 2304, %s734_s27, [#allocation3], %s688_s13, %s688_s13, %s689_s14  }
  0x22   :  { %s690_s26 = smov [#allocation6]   ;;  %s660_s8 = scalar_lea.hbm %s799_s5, 4096 }
  0x23   :  { %s49_s28 = sshll.u32 %s690_s26, 4  ;;  %p661_p2 = scmp.ne.s32.totalorder %s799_s5, %s660_s8  ;;  %s50_s28 = int_to_ptr.vmem [resolvable:$true] %s49_s28 }
  0x24   :  { %p664_p3 = scmp.lt.u32.totalorder %s660_s8, %s799_s5 }
  0x26   :  { %p666_p4 = pnand %p664_p3, %p661_p2 }
  0x28   :  { %669 = shalt.err (!%p666_p4)
}
  0x29   :  { %s670_s15 = scalar_lea.vmem %s50_s28, 4096  ;;  %p675_p6 = scmp.lt.s32.totalorder %s50_s28, %s50_s28 }
  0x2a   :  { %p671_p5 = scmp.ne.s32.totalorder %s50_s28, %s670_s15  ;;  %p676_p7 = scmp.lt.s32.totalorder %s670_s15, %s670_s15 }
  0x2c   :  { %p677_p8 = por %p676_p7, %p675_p6 }
  0x2e   :  { %p678_p9 = pnand %p677_p8, %p671_p5 }
  0x30   :  { %681 = shalt.err (!%p678_p9)
}
  0x31   :  { %s691_s1 = smov 128   ;;  %s692_s27 = smov 8  }
  0x32   :  { %55 = dma.hbm_to_vmem [thread:$0]  %s799_s5, 4096, %s50_s28, [#allocation5], %s691_s1, %s691_s1, %s692_s27  }
  0x33   :  { %682 = dma.done.wait [#allocation3], 2304  }
  0x34   :  { %683 = vsyncadd [#allocation3], 4294964992 }
  0x35   :  { %684 = dma.done.wait [#allocation5], 12288  }
  0x36   :  { %685 = vsyncadd [#allocation5], 4294955008  ;;  %v693_v0 = vmov 0.0   ;;  %v69_v1 = vld [vmem:[#allocation2 + $0x8] sm:$0xff]  ;;  %v71_v2 = vld [vmem:[#allocation2 + $0x18] sm:$0xff]  ;;  %vm102_vm0 = vcmask 1044480  }
  0x37   :  { %173 = vmatprep.mubr.f32.mxu0 %v693_v0  ;;  %v68_v3 = vld [vmem:[#allocation2] sm:$0xff]  ;;  %v494_v4 = vpack.c.bf16 %v71_v2, %v69_v1  ;;  %v70_v5 = vld [vmem:[#allocation2 + $0x10] sm:$0xff]  ;;  %v73_v6 = vld [vmem:[#allocation2 + $0x28] sm:$0xff]  ;;  %vm98_vm1 = vcmask 564224  }
  0x38   :  { %v75_v7 = vld [vmem:[#allocation2 + $0x38] sm:$0xff]  ;;  %v496_v8 = vpack.c.bf16 %v70_v5, %v68_v3  ;;  %v72_v10 = vld [vmem:[#allocation2 + $0x20] sm:$0xff]  ;;  %v74_v11 = vld [vmem:[#allocation2 + $0x30] sm:$0xff] }
  0x39   :  { %v498_v9 = vpack.c.bf16 %v75_v7, %v73_v6  ;;  %v77_v12 = vld [vmem:[#allocation2 + $0x48] sm:$0xff]  ;;  %495 = vmatprep.subr.bf16.mxu0 %v494_v4  ;;  %v79_v13 = vld [vmem:[#allocation2 + $0x58] sm:$0xff]  ;;  %v500_v14 = vpack.c.bf16 %v74_v11, %v72_v10  ;;  %v76_v16 = vld [vmem:[#allocation2 + $0x40] sm:$0xff] }
  0x3a   :  { %497 = vmatpush1.bf16.msra.mxu0 %v496_v8  ;;  %v502_v15 = vpack.c.bf16 %v79_v13, %v77_v12  ;;  %v78_v17 = vld [vmem:[#allocation2 + $0x50] sm:$0xff]  ;;  %v81_v18 = vld [vmem:[#allocation2 + $0x68] sm:$0xff]  ;;  %v83_v19 = vld [vmem:[#allocation2 + $0x78] sm:$0xff] }
  0x3b   :  { %499 = vmatprep.subr.bf16.mxu0 %v498_v9  ;;  %v183_v20 = vld [vmem:[#allocation4 + $0x8] sm:$0xff]  ;;  %v185_v21 = vld [vmem:[#allocation4 + $0x18] sm:$0xff]  ;;  %v80_v22 = vld [vmem:[#allocation2 + $0x60] sm:$0xff]  ;;  %v504_v27 = vpack.c.bf16 %v78_v17, %v76_v16  ;;  %v506_v32 = vpack.c.bf16 %v83_v19, %v81_v18 }
  0x3c   :  { %v510_v23 = vpack.c.bf16 %v185_v21, %v183_v20  ;;  %v182_v24 = vld [vmem:[#allocation4] sm:$0xff]  ;;  %v184_v25 = vld [vmem:[#allocation4 + $0x10] sm:$0xff]  ;;  %v187_v26 = vld [vmem:[#allocation4 + $0x28] sm:$0xff] }
  0x3d   :  { %v512_v28 = vpack.c.bf16 %v184_v25, %v182_v24  ;;  %v189_v29 = vld [vmem:[#allocation4 + $0x38] sm:$0xff]  ;;  %v186_v30 = vld [vmem:[#allocation4 + $0x20] sm:$0xff]  ;;  %v188_v31 = vld [vmem:[#allocation4 + $0x30] sm:$0xff] }
  0x3e   :  { %501 = vmatpush1.bf16.msra.mxu0 %v500_v14  ;;  %v82_v33 = vld [vmem:[#allocation2 + $0x70] sm:$0xff]  ;;  %511 = vmatprep.subr.bf16.mxu1 %v510_v23  ;;  %v514_v34 = vpack.c.bf16 %v189_v29, %v187_v26  ;;  %v191_v35 = vld [vmem:[#allocation4 + $0x48] sm:$0xff]  ;;  %v193_v36 = vld [vmem:[#allocation4 + $0x58] sm:$0xff]  ;;  %v516_v37 = vpack.c.bf16 %v188_v31, %v186_v30 }
  0x3f   :  { %503 = vmatprep.subr.bf16.mxu0 %v502_v15  ;;  %513 = vmatpush1.bf16.msra.mxu1 %v512_v28  ;;  %v518_v38 = vpack.c.bf16 %v193_v36, %v191_v35  ;;  %v190_v39 = vld [vmem:[#allocation4 + $0x40] sm:$0xff]  ;;  %v192_v40 = vld [vmem:[#allocation4 + $0x50] sm:$0xff]  ;;  %v508_v41 = vpack.c.bf16 %v82_v33, %v80_v22  ;;  %v195_v42 = vld [vmem:[#allocation4 + $0x68] sm:$0xff] }
  0x40   :  { %515 = vmatprep.subr.bf16.mxu1 %v514_v34  ;;  %v197_v43 = vld [vmem:[#allocation4 + $0x78] sm:$0xff]  ;;  %v520_v45 = vpack.c.bf16 %v192_v40, %v190_v39  ;;  %v194_v47 = vld [vmem:[#allocation4 + $0x60] sm:$0xff]  ;;  %v196_v48 = vld [vmem:[#allocation4 + $0x70] sm:$0xff] }
  0x41   :  { %v85_v44 = vld [vmem:[#allocation2 + $0x88] sm:$0x1f]  ;;  %v522_v46 = vpack.c.bf16 %v197_v43, %v195_v42  ;;  %v199_v49 = vld [vmem:[#allocation4 + $0x88] sm:$0xff]  ;;  %v84_v51 = vld [vmem:[#allocation2 + $0x80] sm:$0x1f]  ;;  %v524_v53 = vpack.c.bf16 %v196_v48, %v194_v47 }
  0x42   :  { %505 = vmatpush1.bf16.msra.mxu0 %v504_v27  ;;  %v201_v50 = vld [vmem:[#allocation4 + $0x98] sm:$0xff]  ;;  %v67_v52 = vld [vmem:[%s794_s0] sm:$0xff]  ;;  %v198_v55 = vld [vmem:[#allocation4 + $0x80] sm:$0xff] }
  0x43   :  { %507 = vmatprep.subr.bf16.mxu0 %v506_v32  ;;  %517 = vmatpush1.bf16.msra.mxu1 %v516_v37  ;;  %v526_v54 = vpack.c.bf16 %v201_v50, %v199_v49  ;;  %v200_v56 = vld [vmem:[#allocation4 + $0x90] sm:$0xff]  ;;  %v203_v57 = vld [vmem:[#allocation4 + $0xa8] sm:$0xff]  ;;  %v205_v58 = vld [vmem:[#allocation4 + $0xb8] sm:$0xff] }
  0x44   :  { %519 = vmatprep.subr.bf16.mxu1 %v518_v38  ;;  %v528_v59 = vpack.c.bf16 %v200_v56, %v198_v55  ;;  %v530_v60 = vpack.c.bf16 %v205_v58, %v203_v57  ;;  %v202_v61 = vld [vmem:[#allocation4 + $0xa0] sm:$0xff]  ;;  %v204_v62 = vld [vmem:[#allocation4 + $0xb0] sm:$0xff]  ;;  %v207_v63 = vld [vmem:[#allocation4 + $0xc8] sm:$0xff] }
  0x45   :  { %v209_v0 = vld [vmem:[#allocation4 + $0xd8] sm:$0xff]  ;;  %v532_v1 = vpack.c.bf16 %v204_v62, %v202_v61  ;;  %v206_v3 = vld [vmem:[#allocation4 + $0xc0] sm:$0xff]  ;;  %v208_v4 = vld [vmem:[#allocation4 + $0xd0] sm:$0xff] }
  0x46   :  { %509 = vmatpush1.bf16.msra.mxu0 %v508_v41  ;;  %v534_v2 = vpack.c.bf16 %v209_v0, %v207_v63  ;;  %v211_v5 = vld [vmem:[#allocation4 + $0xe8] sm:$0xff]  ;;  %v213_v6 = vld [vmem:[#allocation4 + $0xf8] sm:$0xff]  ;;  %v536_v7 = vpack.c.bf16 %v208_v4, %v206_v3  ;;  %v210_v9 = vld [vmem:[#allocation4 + $0xe0] sm:$0xff] }
  0x47   :  { %455 = vmatprep.subr.msk.mxu0 %vm102_vm0, %v85_v44  ;;  %521 = vmatpush1.bf16.msra.mxu1 %v520_v45  ;;  %v538_v8 = vpack.c.bf16 %v213_v6, %v211_v5  ;;  %v212_v10 = vld [vmem:[#allocation4 + $0xf0] sm:$0xff]  ;;  %v215_v11 = vld [vmem:[#allocation4 + $0x108] sm:$0xff]  ;;  %v217_v12 = vld [vmem:[#allocation4 + $0x118] sm:$0xff] }
  0x48   :  { %523 = vmatprep.subr.bf16.mxu1 %v522_v46  ;;  %v540_v13 = vpack.c.bf16 %v212_v10, %v210_v9  ;;  %v542_v14 = vpack.c.bf16 %v217_v12, %v215_v11  ;;  %v214_v15 = vld [vmem:[#allocation4 + $0x100] sm:$0xff]  ;;  %v216_v16 = vld [vmem:[#allocation4 + $0x110] sm:$0xff]  ;;  %v219_v17 = vld [vmem:[#allocation4 + $0x128] sm:$0xff] }
  0x49   :  { %v221_v18 = vld [vmem:[#allocation4 + $0x138] sm:$0xff]  ;;  %v544_v19 = vpack.c.bf16 %v216_v16, %v214_v15  ;;  %v218_v21 = vld [vmem:[#allocation4 + $0x120] sm:$0xff]  ;;  %v220_v22 = vld [vmem:[#allocation4 + $0x130] sm:$0xff] }
  0x4a   :  { %456 = vmatpush1.msk.msra.mxu0 %vm102_vm0, %v84_v51  ;;  %v546_v20 = vpack.c.bf16 %v221_v18, %v219_v17  ;;  %v223_v23 = vld [vmem:[#allocation4 + $0x148] sm:$0xff]  ;;  %v225_v24 = vld [vmem:[#allocation4 + $0x158] sm:$0xff]  ;;  %v548_v25 = vpack.c.bf16 %v220_v22, %v218_v21  ;;  %v222_v27 = vld [vmem:[#allocation4 + $0x140] sm:$0xff] }
  0x4b   :  { %457 = vmatmul.mubr.msk.f32.vlgmr.msra.gmra.mrb[0].mxu0 %vm98_vm1, %v67_v52  ;;  %525 = vmatpush1.bf16.msra.mxu1 %v524_v53  ;;  %v550_v26 = vpack.c.bf16 %v225_v24, %v223_v23  ;;  %v224_v28 = vld [vmem:[#allocation4 + $0x150] sm:$0xff]  ;;  %v227_v29 = vld [vmem:[#allocation4 + $0x168] sm:$0xff]  ;;  %v229_v30 = vld [vmem:[#allocation4 + $0x178] sm:$0xff] }
  0x4c   :  { %527 = vmatprep.subr.bf16.mxu1 %v526_v54  ;;  %v552_v31 = vpack.c.bf16 %v224_v28, %v222_v27  ;;  %v554_v32 = vpack.c.bf16 %v229_v30, %v227_v29  ;;  %v226_v33 = vld [vmem:[#allocation4 + $0x160] sm:$0xff]  ;;  %v228_v34 = vld [vmem:[#allocation4 + $0x170] sm:$0xff]  ;;  %v231_v35 = vld [vmem:[#allocation4 + $0x188] sm:$0xff] }
  0x4d   :  { %v233_v36 = vld [vmem:[#allocation4 + $0x198] sm:$0xff]  ;;  %v556_v37 = vpack.c.bf16 %v228_v34, %v226_v33  ;;  %v230_v39 = vld [vmem:[#allocation4 + $0x180] sm:$0xff]  ;;  %v232_v40 = vld [vmem:[#allocation4 + $0x190] sm:$0xff] }
  0x4e   :  { %v558_v38 = vpack.c.bf16 %v233_v36, %v231_v35  ;;  %v235_v41 = vld [vmem:[#allocation4 + $0x1a8] sm:$0xff]  ;;  %v237_v42 = vld [vmem:[#allocation4 + $0x1b8] sm:$0xff]  ;;  %v560_v43 = vpack.c.bf16 %v232_v40, %v230_v39  ;;  %v234_v45 = vld [vmem:[#allocation4 + $0x1a0] sm:$0xff]  ;;  %v88_v35 = vlaneseq }
  0x4f   :  { %529 = vmatpush1.bf16.msra.mxu1 %v528_v59  ;;  %v562_v44 = vpack.c.bf16 %v237_v42, %v235_v41  ;;  %v236_v46 = vld [vmem:[#allocation4 + $0x1b0] sm:$0xff]  ;;  %v239_v47 = vld [vmem:[#allocation4 + $0x1c8] sm:$0xff]  ;;  %v241_v48 = vld [vmem:[#allocation4 + $0x1d8] sm:$0xff] }
  0x50   :  { %531 = vmatprep.subr.bf16.mxu1 %v530_v60  ;;  %v564_v49 = vpack.c.bf16 %v236_v46, %v234_v45  ;;  %v566_v50 = vpack.c.bf16 %v241_v48, %v239_v47  ;;  %v238_v51 = vld [vmem:[#allocation4 + $0x1c0] sm:$0xff]  ;;  %v240_v52 = vld [vmem:[#allocation4 + $0x1d0] sm:$0xff]  ;;  %v243_v54 = vld [vmem:[#allocation4 + $0x1e8] sm:$0xff]  ;;  %v89_v36 = vshrl.u32 %v88_v35, 7 }
  0x51   :  { %v568_v53 = vpack.c.bf16 %v240_v52, %v238_v51  ;;  %v245_v55 = vld [vmem:[#allocation4 + $0x1f8] sm:$0xff]  ;;  %v242_v57 = vld [vmem:[#allocation4 + $0x1e0] sm:$0xff]  ;;  %v244_v58 = vld [vmem:[#allocation4 + $0x1f0] sm:$0xff] }
  0x52   :  { %v570_v56 = vpack.c.bf16 %v245_v55, %v243_v54  ;;  %v572_v59 = vpack.c.bf16 %v244_v58, %v242_v57  ;;  %v347_v60 = vld [vmem:[#allocation6 + $0x80] sm:$0xff]  ;;  %v348_v61 = vld [vmem:[#allocation6 + $0x88] sm:$0xff]  ;;  %v333_v5 = vld [vmem:[#allocation6 + $0x10] sm:$0xff]  ;;  %v94_v39 = vsub.s32 1, %v89_v36 }
  0x53   :  { %533 = vmatpush1.bf16.msra.mxu1 %v532_v1  ;;  %v331_v62 = vld [vmem:[#allocation6] sm:$0xff]  ;;  %v574_v63 = vpack.c.bf16 %v348_v61, %v347_v60  ;;  %v332_v0 = vld [vmem:[#allocation6 + $0x8] sm:$0xff]  ;;  %v349_v1 = vld [vmem:[#allocation6 + $0x90] sm:$0xff] }
  0x54   :  { %535 = vmatprep.subr.bf16.mxu1 %v534_v2  ;;  %v350_v2 = vld [vmem:[#allocation6 + $0x98] sm:$0xff]  ;;  %v576_v3 = vpack.c.bf16 %v332_v0, %v331_v62  ;;  %v335_v11 = vld [vmem:[#allocation6 + $0x20] sm:$0xff]  ;;  %v336_v12 = vld [vmem:[#allocation6 + $0x28] sm:$0xff] }
  0x55   :  { %v578_v4 = vpack.c.bf16 %v350_v2, %v349_v1  ;;  %v334_v6 = vld [vmem:[#allocation6 + $0x18] sm:$0xff]  ;;  %575 = vmatprep.subr.bf16.mxu0 %v574_v63  ;;  %v584_v15 = vpack.c.bf16 %v336_v12, %v335_v11  ;;  %v337_v17 = vld [vmem:[#allocation6 + $0x30] sm:$0xff]  ;;  %v339_v23 = vld [vmem:[#allocation6 + $0x40] sm:$0xff]  ;;  %v441_v2 = vand.u32 127, %v88_v35 }
  0x56   :  { %577 = vmatpush3.bf16.msra.mxu0 %v576_v3  ;;  %v580_v9 = vpack.c.bf16 %v334_v6, %v333_v5  ;;  %v338_v18 = vld [vmem:[#allocation6 + $0x38] sm:$0xff]  ;;  %v340_v24 = vld [vmem:[#allocation6 + $0x48] sm:$0xff]  ;;  %v341_v29 = vld [vmem:[#allocation6 + $0x50] sm:$0xff] }
  0x57   :  { %537 = vmatpush1.bf16.msra.mxu1 %v536_v7  ;;  %v351_v7 = vld [vmem:[#allocation6 + $0xa0] sm:$0xff]  ;;  %579 = vmatprep.subr.bf16.mxu0 %v578_v4  ;;  %v588_v21 = vpack.c.bf16 %v338_v18, %v337_v17  ;;  %v592_v27 = vpack.c.bf16 %v340_v24, %v339_v23  ;;  %v342_v30 = vld [vmem:[#allocation6 + $0x58] sm:$0xff]  ;;  %v361_v51 = vld [vmem:[#allocation6 + $0xf0] sm:$0xff]  ;;  %vm442_vm2 = vcmp.ge.s32.totalorder %v441_v2, 64 }
  0x58   :  { %539 = vmatprep.subr.bf16.mxu1 %v538_v8  ;;  %v352_v8 = vld [vmem:[#allocation6 + $0xa8] sm:$0xff]  ;;  %v596_v33 = vpack.c.bf16 %v342_v30, %v341_v29  ;;  %v343_v48 = vld [vmem:[#allocation6 + $0x60] sm:$0xff]  ;;  %v362_v52 = vld [vmem:[#allocation6 + $0xf8] sm:$0xff] }
  0x59   :  { %v582_v10 = vpack.c.bf16 %v352_v8, %v351_v7  ;;  %v345_v54 = vld [vmem:[#allocation6 + $0x70] sm:$0xff]  ;;  %v346_v55 = vld [vmem:[#allocation6 + $0x78] sm:$0xff] }
  0x5a   :  { %581 = vmatpush3.bf16.msra.mxu0 %v580_v9  ;;  %v246_v57 = vld [vmem:[%s798_s4] sm:$0x3] }
  0x5b   :  { %541 = vmatpush1.bf16.msra.mxu1 %v540_v13  ;;  %v353_v13 = vld [vmem:[#allocation6 + $0xb0] sm:$0xff]  ;;  %583 = vmatprep.subr.bf16.mxu0 %v582_v10 }
  0x5c   :  { %543 = vmatprep.subr.bf16.mxu1 %v542_v14  ;;  %v354_v14 = vld [vmem:[#allocation6 + $0xb8] sm:$0xff]  ;;  %v458_v4 = vld [vmem:[%s800_s6] ss:$0 sm:$0xff] }
  0x5d   :  { %v586_v16 = vpack.c.bf16 %v354_v14, %v353_v13 }
  0x5e   :  { %585 = vmatpush3.bf16.msra.mxu0 %v584_v15 }
  0x5f   :  { %545 = vmatpush1.bf16.msra.mxu1 %v544_v19  ;;  %v355_v19 = vld [vmem:[#allocation6 + $0xc0] sm:$0xff]  ;;  %587 = vmatprep.subr.bf16.mxu0 %v586_v16 }
  0x60   :  { %547 = vmatprep.subr.bf16.mxu1 %v546_v20  ;;  %v356_v20 = vld [vmem:[#allocation6 + $0xc8] sm:$0xff] }
  0x61   :  { %v590_v22 = vpack.c.bf16 %v356_v20, %v355_v19 }
  0x62   :  { %589 = vmatpush3.bf16.msra.mxu0 %v588_v21 }
  0x63   :  { %549 = vmatpush1.bf16.msra.mxu1 %v548_v25  ;;  %v357_v25 = vld [vmem:[#allocation6 + $0xd0] sm:$0xff]  ;;  %591 = vmatprep.subr.bf16.mxu0 %v590_v22 }
  0x64   :  { %551 = vmatprep.subr.bf16.mxu1 %v550_v26  ;;  %v358_v26 = vld [vmem:[#allocation6 + $0xd8] sm:$0xff] }
  0x65   :  { %v594_v28 = vpack.c.bf16 %v358_v26, %v357_v25 }
  0x66   :  { %593 = vmatpush3.bf16.msra.mxu0 %v592_v27 }
  0x67   :  { %553 = vmatpush1.bf16.msra.mxu1 %v552_v31  ;;  %v359_v31 = vld [vmem:[#allocation6 + $0xe0] sm:$0xff]  ;;  %595 = vmatprep.subr.bf16.mxu0 %v594_v28 }
  0x68   :  { %555 = vmatprep.subr.bf16.mxu1 %v554_v32  ;;  %v360_v32 = vld [vmem:[#allocation6 + $0xe8] sm:$0xff] }
  0x69   :  { %v598_v34 = vpack.c.bf16 %v360_v32, %v359_v31 }
  0x6a   :  { %597 = vmatpush3.bf16.msra.mxu0 %v596_v33 }
  0x6b   :  { %557 = vmatpush1.bf16.msra.mxu1 %v556_v37  ;;  %599 = vmatprep.subr.bf16.mxu0 %v598_v34  ;;  %v90_v37 = vsub.s32 0, %v89_v36 }
  0x6c   :  { %559 = vmatprep.subr.bf16.mxu1 %v558_v38  ;;  %v86_v38 = vld [vmem:[%s796_s2] sm:$0x3] }
  0x6d   :  { %v91_v40 = vrot.slane %v86_v38, %v90_v37  ;;  %v95_v41 = vrot.slane %v86_v38, %v94_v39  ;;  %v251_v58 = vrot.slane %v246_v57, %v90_v37 }
  0x6f   :  { %561 = vmatpush1.bf16.msra.mxu1 %v560_v43 }
  0x70   :  { %563 = vmatprep.subr.bf16.mxu1 %v562_v44 }
  0x73   :  { %565 = vmatpush1.bf16.msra.mxu1 %v564_v49  ;;  %v344_v49 = vld [vmem:[#allocation6 + $0x68] sm:$0xff] }
  0x74   :  { %567 = vmatprep.subr.bf16.mxu1 %v566_v50  ;;  %v600_v50 = vpack.c.bf16 %v344_v49, %v343_v48 }
  0x76   :  { %601 = vmatpush3.bf16.msra.mxu0 %v600_v50 }
  0x77   :  { %569 = vmatpush1.bf16.msra.mxu1 %v568_v53  ;;  %v602_v53 = vpack.c.bf16 %v362_v52, %v361_v51 }
  0x78   :  { %571 = vmatprep.subr.bf16.mxu1 %v570_v56  ;;  %v604_v56 = vpack.c.bf16 %v346_v55, %v345_v54 }
  0x79   :  { %603 = vmatprep.subr.bf16.mxu0 %v602_v53 }
  0x7a   :  { %605 = vmatpush3.bf16.msra.mxu0 %v604_v56 }
  0x7b   :  { %573 = vmatpush1.bf16.msra.mxu1 %v572_v59  ;;  %v255_v59 = vrot.slane %v246_v57, %v94_v39 }
 0x11e   :  { %v175_v42 = vpop.f32.mrb[0].mxu0 }
 0x11f   :  { %v176_v43 = vadd.f32 %v175_v42, %v91_v40  ;;  %v177_v44 = vpop.f32.mrb[1].mxu0 }
 0x120   :  { %v178_v45 = vadd.f32 %v177_v44, %v95_v41 }
 0x121   :  { %v180_v47 = vmax.f32 %v176_v43, 0.0 }
 0x122   :  { %v181_v46 = vmax.f32 %v178_v45, 0.0 }
 0x124   :  { %322 = vmatprep.mubr.f32.mxu1 %v181_v46 }
 0x125   :  { %323 = vmatmul.mubr.f32.vlgmr.msra.gmra.mrb[0].mxu1 %v180_v47 }
 0x1f8   :  { %v324_v60 = vpop.f32.mrb[0].mxu1 }
 0x1f9   :  { %v325_v61 = vadd.f32 %v324_v60, %v251_v58  ;;  %v326_v62 = vpop.f32.mrb[1].mxu1 }
 0x1fa   :  { %v327_v63 = vadd.f32 %v326_v62, %v255_v59 }
 0x1fb   :  { %v329_v1 = vmax.f32 %v325_v61, 0.0 }
 0x1fc   :  { %v330_v0 = vmax.f32 %v327_v63, 0.0 }
 0x1fe   :  { %434 = vmatprep.mubr.f32.mxu0 %v330_v0 }
 0x1ff   :  { %435 = vmatmul.mubr.f32.vlgmr.msra.gmra.mrb[2].mxu0 %v329_v1 }
 0x2d2   :  { %v491_v3 = vpop.f32.mrb[2].mxu0 }
 0x2d3   :  { %v492_v5 = vpop.f32.mrb[3].mxu0 }
 0x2d4   :  { %v493_v6 = vadd.f32 %v492_v5, %v491_v3 }
 0x2d6   :  { %v437_v7 = vadd.f32 %v493_v6, %v458_v4 }
 0x2d8   :  { %v443_v8 = vsel %vm442_vm2, %v437_v7, 0.0 }
 0x2d9   :  { %v444_v9 = vmul.f32 1.442695, %v443_v8 }
 0x2db   :  { %614 = vpow2.f32 %v444_v9 }
 0x2e5   :  { %v615_v10 = vpop.eup %614 }
 0x2e6   :  { %v446_v11 = vmax.f32 %v615_v10, 1e-06 }
 0x2e8   :  { %v447_v12 = vsel %vm442_vm2, %v446_v11, %v437_v7 }
 0x2e9   :  { %448 = vst [vmem:[%s801_s7] sm:$0xff] %v447_v12 }
 0x2ea   :  { %453 = vsyncpa [#allocation3], 1 }
 0x2eb   :  { %454 = vsyncpa [#allocation5], 1 }

</bundles_post_ra>
